<compile_context>
chip_gen: v6e
topology: v6e:2x2x1
jax: 0.10.0
libtpu: 0.0.40
codegen_flags: <defaults>
</compile_context>

<pallas_src>
import functools

import jax
import jax.numpy as jnp
from jax import lax
from jax.experimental import pallas as pl
from jax.experimental.pallas import tpu as pltpu


# ----------------------------------------------------------------------------
# Fused Z_MLP kernel body (operates on one (TM, D) row tile).
# ----------------------------------------------------------------------------
def _z_mlp_kernel(x_ref, w_ref, b_ref, o_ref, *, n_mlp, neg_slope, eps):
    # PixelNorm over the feature axis (torch dim=1 of an (N, D) tensor).
    x = x_ref[...].astype(jnp.float32)                          # (TM, D)
    mean_sq = jnp.mean(jnp.square(x), axis=-1, keepdims=True)   # (TM, 1)
    h = x * lax.rsqrt(mean_sq + eps)                            # EUP rsqrt

    # n_mlp x (Linear(D, D) + LeakyReLU(0.2)); weights stay VMEM-resident.
    for i in range(n_mlp):                                      # static unroll
        w = w_ref[i].astype(jnp.float32)                        # (D, D) in->out
        b = b_ref[i].astype(jnp.float32)                        # (1, D)
        h = jnp.dot(h, w, preferred_element_type=jnp.float32) + b
        h = jnp.maximum(h, neg_slope * h)                       # LeakyReLU(0.2)

    o_ref[...] = h.astype(o_ref.dtype)


def z_mlp_forward(x, weights, biases, *, neg_slope=0.2, eps=1e-8,
                  block_rows=512):
    """Fused Z_MLP forward.

    x:       (N, D)           input latent codes
    weights: (n_mlp, D, D)    per-layer weights in (in -> out) layout
                              (i.e. torch Linear weight transposed)
    biases:  (n_mlp, D)       per-layer biases
    returns: (N, D)
    """
    N, D = x.shape
    n_mlp = weights.shape[0]
    b3 = biases.reshape(n_mlp, 1, D)   # broadcastable inside the kernel

    # Row tile: either the whole batch (small N) or a multiple-of-8 tile.
    if N <= block_rows:
        tm = N
    else:
        tm = block_rows                # 512 is a multiple of 8 -> valid block
    grid = (pl.cdiv(N, tm),)

    kern = functools.partial(_z_mlp_kernel, n_mlp=n_mlp,
                             neg_slope=neg_slope, eps=eps)
    return pl.pallas_call(
        kern,
        out_shape=jax.ShapeDtypeStruct((N, D), x.dtype),
        grid=grid,
        in_specs=[
            # Row-tiled activations: new block per grid step.
            pl.BlockSpec((tm, D), lambda i: (i, 0)),
            # Weights/biases: constant block index -> fetched once, reused.
            pl.BlockSpec((n_mlp, D, D), lambda i: (0, 0, 0)),
            pl.BlockSpec((n_mlp, 1, D), lambda i: (0, 0, 0)),
        ],
        out_specs=pl.BlockSpec((tm, D), lambda i: (i, 0)),
        compiler_params=pltpu.CompilerParams(
            dimension_semantics=("parallel",)),
    )(x, weights, b3)


# ----------------------------------------------------------------------------
# Pure-JAX reference (mirrors the PyTorch module exactly) for a tolerance check.
# ----------------------------------------------------------------------------
def z_mlp_ref(x, weights, biases, neg_slope=0.2, eps=1e-8):
    h = x * lax.rsqrt(jnp.mean(jnp.square(x), axis=-1, keepdims=True) + eps)
    for i in range(weights.shape[0]):
        h = h @ weights[i] + biases[i]
        h = jnp.where(h >= 0.0, h, neg_slope * h)
    return h


if __name__ == "__main__":
    # Small shapes consistent with a latent-code MLP: batch=8, in_dim=128,
    # n_mlp=4.  D=128 keeps the kernel lane-dense and MXU-column-full.
    N, D, n_mlp = 8, 128, 4

    key = jax.random.PRNGKey(0)
    kx, kw, kb = jax.random.split(key, 3)
    x = jax.random.normal(kx, (N, D), jnp.float32)
    # Weights stored in (in -> out) layout (torch Linear weight transposed).
    weights = (0.05 * jax.random.normal(kw, (n_mlp, D, D))).astype(jnp.float32)
    biases = (0.01 * jax.random.normal(kb, (n_mlp, D))).astype(jnp.float32)

    fwd = jax.jit(z_mlp_forward)
    out = fwd(x, weights, biases)
    jax.block_until_ready(out)

    assert out.shape == (N, D), out.shape
    assert out.dtype == jnp.float32

    ref = z_mlp_ref(x, weights, biases)
    max_err = float(jnp.max(jnp.abs(out - ref)))
    assert max_err < 1e-4, f"mismatch vs reference: {max_err}"

    print("KERNEL_OK")
</pallas_src>

<mosaic_0001>
module attributes {stable_mosaic.version = 11 : i64} {
  func.func @_z_mlp_kernel(%arg0: i32, %arg1: memref<8x128xf32, #tpu.memory_space<vmem>>, %arg2: memref<4x128x128xf32, #tpu.memory_space<vmem>>, %arg3: memref<4x1x128xf32, #tpu.memory_space<vmem>>, %arg4: memref<8x128xf32, #tpu.memory_space<vmem>>) attributes {dimension_semantics = [#tpu.dimension_semantics<parallel>], iteration_bounds = array<i64: 1>, scalar_prefetch = 0 : i64, scratch_operands = 0 : i64, tpu.core_type = #tpu.core_type<tc>, window_params = [{transform_indices = @transform_0, window_bounds = array<i64: 8, 128>}, {pipeline_mode = #tpu.pipeline_mode<synchronous>, transform_indices = @transform_1, window_bounds = array<i64: 4, 128, 128>}, {pipeline_mode = #tpu.pipeline_mode<synchronous>, transform_indices = @transform_2, window_bounds = array<i64: 4, 1, 128>}, {transform_indices = @transform_3, window_bounds = array<i64: 8, 128>}]} {
    %c0 = arith.constant 0 : index
    %c0_0 = arith.constant 0 : index
    %0 = vector.load %arg1[%c0, %c0_0] : memref<8x128xf32, #tpu.memory_space<vmem>>, vector<8x128xf32>
    %1 = arith.mulf %0, %0 : vector<8x128xf32>
    %cst = arith.constant dense<0.000000e+00> : vector<8xf32>
    %2 = vector.multi_reduction <add>, %1, %cst [1] : vector<8x128xf32> to vector<8xf32>
    %3 = vector.shape_cast %2 : vector<8xf32> to vector<8x1xf32>
    %cst_1 = arith.constant 1.280000e+02 : f32
    %4 = vector.broadcast %cst_1 : f32 to vector<8x1xf32>
    %5 = arith.divf %3, %4 : vector<8x1xf32>
    %cst_2 = arith.constant 9.99999993E-9 : f32
    %6 = vector.broadcast %cst_2 : f32 to vector<8x1xf32>
    %7 = arith.addf %5, %6 : vector<8x1xf32>
    %8 = math.rsqrt %7 : vector<8x1xf32>
    %9 = vector.broadcast %8 : vector<8x1xf32> to vector<8x128xf32>
    %10 = arith.mulf %0, %9 : vector<8x128xf32>
    %c0_3 = arith.constant 0 : index
    %c0_4 = arith.constant 0 : index
    %c0_5 = arith.constant 0 : index
    %11 = vector.load %arg2[%c0_3, %c0_4, %c0_5] : memref<4x128x128xf32, #tpu.memory_space<vmem>>, vector<1x128x128xf32>
    %12 = vector.shape_cast %11 : vector<1x128x128xf32> to vector<128x128xf32>
    %c0_6 = arith.constant 0 : index
    %c0_7 = arith.constant 0 : index
    %c0_8 = arith.constant 0 : index
    %13 = vector.load %arg3[%c0_6, %c0_7, %c0_8] : memref<4x1x128xf32, #tpu.memory_space<vmem>>, vector<1x1x128xf32>
    %14 = vector.shape_cast %13 : vector<1x1x128xf32> to vector<1x128xf32>
    %cst_9 = arith.constant dense<0.000000e+00> : vector<8x128xf32>
    %15 = tpu.matmul %10, %12, %cst_9 {dimension_numbers = #tpu.dot_dimension_numbers<[1], [0], [0], [1], [0, 0, 1, 1], [], []>} : vector<8x128xf32>, vector<128x128xf32>, vector<8x128xf32> -> vector<8x128xf32>
    %16 = vector.broadcast %14 : vector<1x128xf32> to vector<8x128xf32>
    %17 = arith.addf %15, %16 : vector<8x128xf32>
    %cst_10 = arith.constant 2.000000e-01 : f32
    %18 = vector.broadcast %cst_10 : f32 to vector<8x128xf32>
    %19 = arith.mulf %18, %17 : vector<8x128xf32>
    %20 = arith.maximumf %17, %19 : vector<8x128xf32>
    %c1 = arith.constant 1 : index
    %c0_11 = arith.constant 0 : index
    %c0_12 = arith.constant 0 : index
    %21 = vector.load %arg2[%c1, %c0_11, %c0_12] : memref<4x128x128xf32, #tpu.memory_space<vmem>>, vector<1x128x128xf32>
    %22 = vector.shape_cast %21 : vector<1x128x128xf32> to vector<128x128xf32>
    %c1_13 = arith.constant 1 : index
    %c0_14 = arith.constant 0 : index
    %c0_15 = arith.constant 0 : index
    %23 = vector.load %arg3[%c1_13, %c0_14, %c0_15] : memref<4x1x128xf32, #tpu.memory_space<vmem>>, vector<1x1x128xf32>
    %24 = vector.shape_cast %23 : vector<1x1x128xf32> to vector<1x128xf32>
    %cst_16 = arith.constant dense<0.000000e+00> : vector<8x128xf32>
    %25 = tpu.matmul %20, %22, %cst_16 {dimension_numbers = #tpu.dot_dimension_numbers<[1], [0], [0], [1], [0, 0, 1, 1], [], []>} : vector<8x128xf32>, vector<128x128xf32>, vector<8x128xf32> -> vector<8x128xf32>
    %26 = vector.broadcast %24 : vector<1x128xf32> to vector<8x128xf32>
    %27 = arith.addf %25, %26 : vector<8x128xf32>
    %cst_17 = arith.constant 2.000000e-01 : f32
    %28 = vector.broadcast %cst_17 : f32 to vector<8x128xf32>
    %29 = arith.mulf %28, %27 : vector<8x128xf32>
    %30 = arith.maximumf %27, %29 : vector<8x128xf32>
    %c2 = arith.constant 2 : index
    %c0_18 = arith.constant 0 : index
    %c0_19 = arith.constant 0 : index
    %31 = vector.load %arg2[%c2, %c0_18, %c0_19] : memref<4x128x128xf32, #tpu.memory_space<vmem>>, vector<1x128x128xf32>
    %32 = vector.shape_cast %31 : vector<1x128x128xf32> to vector<128x128xf32>
    %c2_20 = arith.constant 2 : index
    %c0_21 = arith.constant 0 : index
    %c0_22 = arith.constant 0 : index
    %33 = vector.load %arg3[%c2_20, %c0_21, %c0_22] : memref<4x1x128xf32, #tpu.memory_space<vmem>>, vector<1x1x128xf32>
    %34 = vector.shape_cast %33 : vector<1x1x128xf32> to vector<1x128xf32>
    %cst_23 = arith.constant dense<0.000000e+00> : vector<8x128xf32>
    %35 = tpu.matmul %30, %32, %cst_23 {dimension_numbers = #tpu.dot_dimension_numbers<[1], [0], [0], [1], [0, 0, 1, 1], [], []>} : vector<8x128xf32>, vector<128x128xf32>, vector<8x128xf32> -> vector<8x128xf32>
    %36 = vector.broadcast %34 : vector<1x128xf32> to vector<8x128xf32>
    %37 = arith.addf %35, %36 : vector<8x128xf32>
    %cst_24 = arith.constant 2.000000e-01 : f32
    %38 = vector.broadcast %cst_24 : f32 to vector<8x128xf32>
    %39 = arith.mulf %38, %37 : vector<8x128xf32>
    %40 = arith.maximumf %37, %39 : vector<8x128xf32>
    %c3 = arith.constant 3 : index
    %c0_25 = arith.constant 0 : index
    %c0_26 = arith.constant 0 : index
    %41 = vector.load %arg2[%c3, %c0_25, %c0_26] : memref<4x128x128xf32, #tpu.memory_space<vmem>>, vector<1x128x128xf32>
    %42 = vector.shape_cast %41 : vector<1x128x128xf32> to vector<128x128xf32>
    %c3_27 = arith.constant 3 : index
    %c0_28 = arith.constant 0 : index
    %c0_29 = arith.constant 0 : index
    %43 = vector.load %arg3[%c3_27, %c0_28, %c0_29] : memref<4x1x128xf32, #tpu.memory_space<vmem>>, vector<1x1x128xf32>
    %44 = vector.shape_cast %43 : vector<1x1x128xf32> to vector<1x128xf32>
    %cst_30 = arith.constant dense<0.000000e+00> : vector<8x128xf32>
    %45 = tpu.matmul %40, %42, %cst_30 {dimension_numbers = #tpu.dot_dimension_numbers<[1], [0], [0], [1], [0, 0, 1, 1], [], []>} : vector<8x128xf32>, vector<128x128xf32>, vector<8x128xf32> -> vector<8x128xf32>
    %46 = vector.broadcast %44 : vector<1x128xf32> to vector<8x128xf32>
    %47 = arith.addf %45, %46 : vector<8x128xf32>
    %cst_31 = arith.constant 2.000000e-01 : f32
    %48 = vector.broadcast %cst_31 : f32 to vector<8x128xf32>
    %49 = arith.mulf %48, %47 : vector<8x128xf32>
    %50 = arith.maximumf %47, %49 : vector<8x128xf32>
    %c0_32 = arith.constant 0 : index
    %c0_33 = arith.constant 0 : index
    %51 = vector.load %arg4[%c0_32, %c0_33] : memref<8x128xf32, #tpu.memory_space<vmem>>, vector<8x128xf32>
    tpu.vector_store %arg4[%c0_32, %c0_33], %50 {strides = array<i32>} : memref<8x128xf32, #tpu.memory_space<vmem>>, vector<8x128xf32>,
    return
  }
  func.func @transform_0(%arg0: i32) -> (i32, i32) {
    %c0_i32 = arith.constant 0 : i32
    %c0_i32_0 = arith.constant 0 : i32
    return %arg0, %c0_i32 : i32, i32
  }
  func.func @transform_1(%arg0: i32) -> (i32, i32, i32) {
    %c0_i32 = arith.constant 0 : i32
    %c0_i32_0 = arith.constant 0 : i32
    %c0_i32_1 = arith.constant 0 : i32
    %c0_i32_2 = arith.constant 0 : i32
    return %c0_i32, %c0_i32_0, %c0_i32_1 : i32, i32, i32
  }
  func.func @transform_2(%arg0: i32) -> (i32, i32, i32) {
    %c0_i32 = arith.constant 0 : i32
    %c0_i32_0 = arith.constant 0 : i32
    %c0_i32_1 = arith.constant 0 : i32
    %c0_i32_2 = arith.constant 0 : i32
    return %c0_i32, %c0_i32_0, %c0_i32_1 : i32, i32, i32
  }
  func.func @transform_3(%arg0: i32) -> (i32, i32) {
    %c0_i32 = arith.constant 0 : i32
    %c0_i32_0 = arith.constant 0 : i32
    return %arg0, %c0_i32 : i32, i32
  }
}

</mosaic_0001>

<bundles_post_ra>
// kernel: z_mlp_forward.1
= control target key start
LH: loop header
LB: loop body
LE: loop exit
PB: predicated region body
PF: predicated region fallthrough
CT: control target
= control target key end

     0   :  { %8 = vsyncpa [#allocation3], 0  ;;  %s868_s0 = inlined_call_operand.hbm [shape: f32[8,128], index: 0, kind: input, shape index: {}]   ;;  %s869_s1 = inlined_call_operand.hbm [shape: f32[4,128,128], index: 1, kind: input, shape index: {}]   ;;  %s870_s2 = inlined_call_operand.vmem [shape: f32[4,1,128], index: 2, kind: input, shape index: {}]   ;;  %s871_s3 = inlined_call_operand.hbm [shape: f32[8,128], index: 3, kind: output, shape index: {}]  }
   0x1   :  { %9 = vsyncpa [#allocation6], 0 }
   0x2   :  { %10 = vsyncpa [#allocation4], 0  ;;  %s743_s12 = smov [#allocation2]   ;;  %s744_s14 = smov [#allocation5]  }
   0x3   :  { %s17_s13 = sshll.u32 %s743_s12, 4  ;;  %s26_s15 = sshll.u32 %s744_s14, 4  ;;  %s18_s13 = int_to_ptr.vmem [resolvable:$true] %s17_s13  ;;  %s27_s15 = int_to_ptr.vmem [resolvable:$true] %s26_s15 }
   0x4   :  { %s685_s16 = scalar_lea.vmem %s18_s13, 128  ;;  %p690_p1 = scmp.lt.s32.totalorder %s18_s13, %s18_s13 }
   0x5   :  { %p686_p0 = scmp.ne.s32.totalorder %s18_s13, %s685_s16  ;;  %p691_p2 = scmp.lt.s32.totalorder %s685_s16, %s685_s16 }
   0x7   :  { %p692_p3 = por %p691_p2, %p690_p1 }
   0x9   :  { %p693_p4 = pnand %p692_p3, %p686_p0 }
   0xb   :  { %696 = shalt.err (!%p693_p4)
}
   0xc   :  { %20 = dma.hbm_to_vmem [thread:$0]  %s868_s0, 128, %s18_s13, [#allocation3]  }
   0xd   :  { %s705_s19 = scalar_lea.vmem %s27_s15, 8192  ;;  %p710_p6 = scmp.lt.s32.totalorder %s27_s15, %s27_s15 }
   0xe   :  { %p706_p5 = scmp.ne.s32.totalorder %s27_s15, %s705_s19  ;;  %p711_p7 = scmp.lt.s32.totalorder %s705_s19, %s705_s19 }
  0x10   :  { %p712_p8 = por %p711_p7, %p710_p6 }
  0x12   :  { %p713_p9 = pnand %p712_p8, %p706_p5 }
  0x14   :  { %716 = shalt.err (!%p713_p9)
}
  0x15   :  { %s745_s20 = smov 128   ;;  %s746_s21 = smov 8  }
  0x16   :  { %32 = dma.hbm_to_vmem [thread:$0]  %s869_s1, 8192, %s27_s15, [#allocation6], %s745_s20, %s745_s20, %s746_s21  }
  0x17   :  { %737 = dma.done.wait [#allocation3], 128  }
  0x18   :  { %738 = vsyncadd [#allocation3], 4294967168 }
  0x19   :  { %739 = dma.done.wait [#allocation6], 8192  }
  0x1a   :  { %740 = vsyncadd [#allocation6], 4294959104  ;;  %v747_v0 = vmov 0.0   ;;  %v778_v1 = vld [vmem:[#allocation2] sm:$0xff]  ;;  %v64_v3 = vld [vmem:[#allocation5 + $0x70] sm:$0xff]  ;;  %vm748_vm0 = vmmov 0  }
  0x1b   :  { %528 = vmatprep.subr.mxu0 %v747_v0  ;;  %563 = vmatprep.subr.mxu1 %v747_v0  ;;  %v65_v2 = vld [vmem:[#allocation5 + $0x78] sm:$0xff]  ;;  %v42_v4 = vmul.f32 %v778_v1, %v778_v1  ;;  %v63_v5 = vld [vmem:[#allocation5 + $0x68] sm:$0xff]  ;;  %v62_v6 = vld [vmem:[#allocation5 + $0x60] sm:$0xff]  ;;  %s749_s30 = smov [#allocation7]  }
  0x1c   :  { %529 = vmatpush3.msra.mxu0 %v65_v2  ;;  %v61_v7 = vld [vmem:[#allocation5 + $0x58] sm:$0xff]  ;;  %v60_v8 = vld [vmem:[#allocation5 + $0x50] sm:$0xff]  ;;  %v59_v9 = vld [vmem:[#allocation5 + $0x48] sm:$0xff]  ;;  %560 = vmatprep.mubr.msk.f32.mxu0 %vm748_vm0, %v747_v0  ;;  %s443_s4 = sshll.u32 %s749_s30, 4  ;;  %s444_s4 = int_to_ptr.vmem [resolvable:$true] %s443_s4 }
  0x1d   :  { %530 = vmatprep.subr.mxu0 %v747_v0  ;;  %43 = vadd.xlane.f32.xlu0 %v42_v4  ;;  %v58_v10 = vld [vmem:[#allocation5 + $0x40] sm:$0xff]  ;;  %v57_v11 = vld [vmem:[#allocation5 + $0x38] sm:$0xff]  ;;  %v56_v12 = vld [vmem:[#allocation5 + $0x30] sm:$0xff]  ;;  %s717_s5 = scalar_lea.vmem %s444_s4, 128  ;;  %p722_p11 = scmp.lt.s32.totalorder %s444_s4, %s444_s4 }
  0x1e   :  { %531 = vmatpush3.msra.mxu0 %v64_v3  ;;  %v55_v13 = vld [vmem:[#allocation5 + $0x28] sm:$0xff]  ;;  %595 = vmatprep.mubr.msk.f32.mxu1 %vm748_vm0, %v747_v0  ;;  %v54_v14 = vld [vmem:[#allocation5 + $0x20] sm:$0xff]  ;;  %v53_v15 = vld [vmem:[#allocation5 + $0x18] sm:$0xff]  ;;  %p718_p10 = scmp.ne.s32.totalorder %s444_s4, %s717_s5  ;;  %p723_p12 = scmp.lt.s32.totalorder %s717_s5, %s717_s5 }
  0x1f   :  { %532 = vmatprep.subr.mxu0 %v747_v0  ;;  %v52_v16 = vld [vmem:[#allocation5 + $0x10] sm:$0xff]  ;;  %v51_v17 = vld [vmem:[#allocation5 + $0x8] sm:$0xff]  ;;  %v50_v18 = vld [vmem:[#allocation5] sm:$0xff] }
  0x20   :  { %533 = vmatpush3.msra.mxu0 %v63_v5  ;;  %v161_v19 = vld [vmem:[#allocation5 + $0xf8] sm:$0xff]  ;;  %v160_v20 = vld [vmem:[#allocation5 + $0xf0] sm:$0xff]  ;;  %v159_v21 = vld [vmem:[#allocation5 + $0xe8] sm:$0xff]  ;;  %p724_p13 = por %p723_p12, %p722_p11 }
  0x21   :  { %534 = vmatprep.subr.mxu0 %v747_v0  ;;  %564 = vmatpush3.msra.mxu1 %v161_v19  ;;  %v158_v22 = vld [vmem:[#allocation5 + $0xe0] sm:$0xff]  ;;  %v157_v23 = vld [vmem:[#allocation5 + $0xd8] sm:$0xff]  ;;  %v156_v24 = vld [vmem:[#allocation5 + $0xd0] sm:$0xff] }
  0x22   :  { %535 = vmatpush3.msra.mxu0 %v62_v6  ;;  %565 = vmatprep.subr.mxu1 %v747_v0  ;;  %v155_v25 = vld [vmem:[#allocation5 + $0xc8] sm:$0xff]  ;;  %v154_v26 = vld [vmem:[#allocation5 + $0xc0] sm:$0xff]  ;;  %v153_v27 = vld [vmem:[#allocation5 + $0xb8] sm:$0xff]  ;;  %p725_p0 = pnand %p724_p13, %p718_p10 }
  0x23   :  { %536 = vmatprep.subr.mxu0 %v747_v0  ;;  %566 = vmatpush3.msra.mxu1 %v160_v20  ;;  %v152_v28 = vld [vmem:[#allocation5 + $0xb0] sm:$0xff]  ;;  %v151_v29 = vld [vmem:[#allocation5 + $0xa8] sm:$0xff]  ;;  %v150_v30 = vld [vmem:[#allocation5 + $0xa0] sm:$0xff] }
  0x24   :  { %537 = vmatpush3.msra.mxu0 %v61_v7  ;;  %567 = vmatprep.subr.mxu1 %v747_v0  ;;  %v149_v36 = vld [vmem:[#allocation5 + $0x98] sm:$0xff]  ;;  %v148_v37 = vld [vmem:[#allocation5 + $0x90] sm:$0xff]  ;;  %v147_v38 = vld [vmem:[#allocation5 + $0x88] sm:$0xff] }
  0x25   :  { %538 = vmatprep.subr.mxu0 %v747_v0  ;;  %568 = vmatpush3.msra.mxu1 %v159_v21  ;;  %v146_v39 = vld [vmem:[#allocation5 + $0x80] sm:$0xff]  ;;  %v258_v40 = vld [vmem:[#allocation5 + $0x178] sm:$0xff]  ;;  %v257_v41 = vld [vmem:[#allocation5 + $0x170] sm:$0xff] }
  0x26   :  { %539 = vmatpush3.msra.mxu0 %v60_v8  ;;  %569 = vmatprep.subr.mxu1 %v747_v0  ;;  %v256_v42 = vld [vmem:[#allocation5 + $0x168] sm:$0xff]  ;;  %v255_v43 = vld [vmem:[#allocation5 + $0x160] sm:$0xff]  ;;  %v254_v44 = vld [vmem:[#allocation5 + $0x158] sm:$0xff] }
  0x27   :  { %540 = vmatprep.subr.mxu0 %v747_v0  ;;  %570 = vmatpush3.msra.mxu1 %v158_v22  ;;  %v253_v45 = vld [vmem:[#allocation5 + $0x150] sm:$0xff]  ;;  %v252_v46 = vld [vmem:[#allocation5 + $0x148] sm:$0xff]  ;;  %v251_v47 = vld [vmem:[#allocation5 + $0x140] sm:$0xff] }
  0x28   :  { %541 = vmatpush3.msra.mxu0 %v59_v9  ;;  %571 = vmatprep.subr.mxu1 %v747_v0  ;;  %v250_v48 = vld [vmem:[#allocation5 + $0x138] sm:$0xff]  ;;  %v249_v49 = vld [vmem:[#allocation5 + $0x130] sm:$0xff]  ;;  %v248_v50 = vld [vmem:[#allocation5 + $0x128] sm:$0xff] }
  0x29   :  { %542 = vmatprep.subr.mxu0 %v747_v0  ;;  %572 = vmatpush3.msra.mxu1 %v157_v23  ;;  %v247_v51 = vld [vmem:[#allocation5 + $0x120] sm:$0xff]  ;;  %v453_v52 = vld [vmem:[%s870_s2] ss:$0 sm:$0xff]  ;;  %v245_v59 = vld [vmem:[#allocation5 + $0x110] sm:$0xff] }
  0x2a   :  { %543 = vmatpush3.msra.mxu0 %v58_v10  ;;  %573 = vmatprep.subr.mxu1 %v747_v0  ;;  %v246_v58 = vld [vmem:[#allocation5 + $0x118] sm:$0xff]  ;;  %v244_v60 = vld [vmem:[#allocation5 + $0x108] sm:$0xff]  ;;  %v243_v61 = vld [vmem:[#allocation5 + $0x100] sm:$0xff] }
  0x2b   :  { %544 = vmatprep.subr.mxu0 %v747_v0  ;;  %574 = vmatpush3.msra.mxu1 %v156_v24  ;;  %v355_v62 = vld [vmem:[#allocation5 + $0x1f8] sm:$0xff]  ;;  %v354_v63 = vld [vmem:[#allocation5 + $0x1f0] sm:$0xff]  ;;  %v352_v2 = vld [vmem:[#allocation5 + $0x1e0] sm:$0xff] }
  0x2c   :  { %545 = vmatpush3.msra.mxu0 %v57_v11  ;;  %575 = vmatprep.subr.mxu1 %v747_v0  ;;  %v351_v3 = vld [vmem:[#allocation5 + $0x1d8] sm:$0xff]  ;;  %v350_v4 = vld [vmem:[#allocation5 + $0x1d0] sm:$0xff]  ;;  %v349_v5 = vld [vmem:[#allocation5 + $0x1c8] sm:$0xff] }
  0x2d   :  { %546 = vmatprep.subr.mxu0 %v747_v0  ;;  %576 = vmatpush3.msra.mxu1 %v155_v25  ;;  %v348_v6 = vld [vmem:[#allocation5 + $0x1c0] sm:$0xff]  ;;  %v347_v7 = vld [vmem:[#allocation5 + $0x1b8] sm:$0xff]  ;;  %v346_v8 = vld [vmem:[#allocation5 + $0x1b0] sm:$0xff] }
  0x2e   :  { %547 = vmatpush3.msra.mxu0 %v56_v12  ;;  %577 = vmatprep.subr.mxu1 %v747_v0  ;;  %v345_v9 = vld [vmem:[#allocation5 + $0x1a8] sm:$0xff]  ;;  %v344_v10 = vld [vmem:[#allocation5 + $0x1a0] sm:$0xff]  ;;  %v455_v11 = vld [vmem:[%s870_s2 + $0x1] ss:$0 sm:$0xff] }
  0x2f   :  { %548 = vmatprep.subr.mxu0 %v747_v0  ;;  %578 = vmatpush3.msra.mxu1 %v154_v26  ;;  %v341_v19 = vld [vmem:[#allocation5 + $0x188] sm:$0xff]  ;;  %v340_v20 = vld [vmem:[#allocation5 + $0x180] sm:$0xff]  ;;  %v457_v21 = vld [vmem:[%s870_s2 + $0x2] ss:$0 sm:$0xff] }
  0x30   :  { %549 = vmatpush3.msra.mxu0 %v55_v13  ;;  %579 = vmatprep.subr.mxu1 %v747_v0 }
  0x31   :  { %550 = vmatprep.subr.mxu0 %v747_v0  ;;  %580 = vmatpush3.msra.mxu1 %v153_v27  ;;  %v459_v27 = vld [vmem:[%s870_s2 + $0x3] ss:$0 sm:$0xff] }
  0x32   :  { %551 = vmatpush3.msra.mxu0 %v54_v14  ;;  %581 = vmatprep.subr.mxu1 %v747_v0 }
  0x33   :  { %552 = vmatprep.subr.mxu0 %v747_v0  ;;  %582 = vmatpush3.msra.mxu1 %v152_v28 }
  0x34   :  { %553 = vmatpush3.msra.mxu0 %v53_v15  ;;  %583 = vmatprep.subr.mxu1 %v747_v0 }
  0x35   :  { %554 = vmatprep.subr.mxu0 %v747_v0  ;;  %584 = vmatpush3.msra.mxu1 %v151_v29 }
  0x36   :  { %555 = vmatpush3.msra.mxu0 %v52_v16  ;;  %585 = vmatprep.subr.mxu1 %v747_v0 }
  0x37   :  { %556 = vmatprep.subr.mxu0 %v747_v0  ;;  %586 = vmatpush3.msra.mxu1 %v150_v30 }
  0x38   :  { %557 = vmatpush3.msra.mxu0 %v51_v17  ;;  %587 = vmatprep.subr.mxu1 %v747_v0  ;;  %v343_v17 = vld [vmem:[#allocation5 + $0x198] sm:$0xff] }
  0x39   :  { %558 = vmatprep.subr.mxu0 %v747_v0  ;;  %588 = vmatpush3.msra.mxu1 %v149_v36 }
  0x3a   :  { %559 = vmatpush3.msra.mxu0 %v50_v18  ;;  %589 = vmatprep.subr.mxu1 %v747_v0  ;;  %v342_v18 = vld [vmem:[#allocation5 + $0x190] sm:$0xff] }
  0x3b   :  { %598 = vmatprep.subr.mxu0 %v747_v0  ;;  %590 = vmatpush3.msra.mxu1 %v148_v37 }
  0x3c   :  { %591 = vmatprep.subr.mxu1 %v747_v0 }
  0x3d   :  { %592 = vmatpush3.msra.mxu1 %v147_v38 }
  0x3e   :  { %593 = vmatprep.subr.mxu1 %v747_v0 }
  0x3f   :  { %594 = vmatpush3.msra.mxu1 %v146_v39 }
  0x40   :  { %633 = vmatprep.subr.mxu1 %v747_v0 }
  0xa6   :  { %v44_v31 = vpop.xlane.xlu0 %43 }
  0xa7   :  { %v46_v32 = vmul.f32 0.0078125, %v44_v31 }
  0xa9   :  { %v47_v33 = vadd.f32 1e-08, %v46_v32 }
  0xab   :  { %675 = vrsqrt.f32 %v47_v33 }
  0xb8   :  { %v676_v34 = vpop.eup %675 }
  0xb9   :  { %v49_v35 = vmul.f32 %v676_v34, %v778_v1  ;;  %v353_v1 = vld [vmem:[#allocation5 + $0x1e8] sm:$0xff] }
  0xbb   :  { %561 = vmatmul.mubr.f32.vlgmr.msra.gmra.mxu0 %v49_v35 }
  0xbc   :  { %630 = vmatprep.mubr.msk.f32.mxu0 %vm748_vm0, %v747_v0  ;;  %599 = vmatpush3.msra.mxu0 %v258_v40 }
  0xbd   :  { %600 = vmatprep.subr.mxu0 %v747_v0 }
  0xbe   :  { %601 = vmatpush3.msra.mxu0 %v257_v41 }
  0xbf   :  { %602 = vmatprep.subr.mxu0 %v747_v0 }
  0xc0   :  { %603 = vmatpush3.msra.mxu0 %v256_v42 }
  0xc1   :  { %604 = vmatprep.subr.mxu0 %v747_v0 }
  0xc2   :  { %605 = vmatpush3.msra.mxu0 %v255_v43 }
  0xc3   :  { %606 = vmatprep.subr.mxu0 %v747_v0 }
  0xc4   :  { %607 = vmatpush3.msra.mxu0 %v254_v44 }
  0xc5   :  { %608 = vmatprep.subr.mxu0 %v747_v0 }
  0xc6   :  { %609 = vmatpush3.msra.mxu0 %v253_v45 }
  0xc7   :  { %610 = vmatprep.subr.mxu0 %v747_v0 }
  0xc8   :  { %611 = vmatpush3.msra.mxu0 %v252_v46 }
  0xc9   :  { %612 = vmatprep.subr.mxu0 %v747_v0 }
  0xca   :  { %613 = vmatpush3.msra.mxu0 %v251_v47 }
  0xcb   :  { %614 = vmatprep.subr.mxu0 %v747_v0 }
  0xcc   :  { %615 = vmatpush3.msra.mxu0 %v250_v48 }
  0xcd   :  { %616 = vmatprep.subr.mxu0 %v747_v0 }
  0xce   :  { %617 = vmatpush3.msra.mxu0 %v249_v49 }
  0xcf   :  { %618 = vmatprep.subr.mxu0 %v747_v0 }
  0xd0   :  { %619 = vmatpush3.msra.mxu0 %v248_v50 }
  0xd1   :  { %620 = vmatprep.subr.mxu0 %v747_v0 }
  0xd2   :  { %621 = vmatpush3.msra.mxu0 %v247_v51 }
  0xd3   :  { %622 = vmatprep.subr.mxu0 %v747_v0 }
  0xd4   :  { %623 = vmatpush3.msra.mxu0 %v246_v58 }
  0xd5   :  { %624 = vmatprep.subr.mxu0 %v747_v0 }
  0xd6   :  { %625 = vmatpush3.msra.mxu0 %v245_v59 }
  0xd7   :  { %626 = vmatprep.subr.mxu0 %v747_v0 }
  0xd8   :  { %627 = vmatpush3.msra.mxu0 %v244_v60 }
  0xd9   :  { %628 = vmatprep.subr.mxu0 %v747_v0 }
  0xda   :  { %629 = vmatpush3.msra.mxu0 %v243_v61 }
 0x17b   :  { %v139_v53 = vpop.f32.mrf.mxu0 }
 0x17c   :  { %v140_v54 = vadd.f32 %v453_v52, %v139_v53 }
 0x17d   :  { %v562_v55 = vpop.f32.mrf.mxu0 }
 0x17e   :  { %v143_v56 = vmul.f32 0.2, %v140_v54 }
 0x180   :  { %v144_v57 = vmax.f32 %v140_v54, %v143_v56 }
 0x182   :  { %596 = vmatmul.mubr.f32.vlgmr.msra.gmra.mxu1 %v144_v57 }
 0x183   :  { %665 = vmatprep.mubr.msk.f32.mxu1 %vm748_vm0, %v747_v0  ;;  %634 = vmatpush3.msra.mxu1 %v355_v62 }
 0x184   :  { %635 = vmatprep.subr.mxu1 %v747_v0 }
 0x185   :  { %636 = vmatpush3.msra.mxu1 %v354_v63 }
 0x186   :  { %637 = vmatprep.subr.mxu1 %v747_v0 }
 0x187   :  { %638 = vmatpush3.msra.mxu1 %v353_v1 }
 0x188   :  { %639 = vmatprep.subr.mxu1 %v747_v0 }
 0x189   :  { %640 = vmatpush3.msra.mxu1 %v352_v2 }
 0x18a   :  { %641 = vmatprep.subr.mxu1 %v747_v0 }
 0x18b   :  { %642 = vmatpush3.msra.mxu1 %v351_v3 }
 0x18c   :  { %643 = vmatprep.subr.mxu1 %v747_v0 }
 0x18d   :  { %644 = vmatpush3.msra.mxu1 %v350_v4 }
 0x18e   :  { %645 = vmatprep.subr.mxu1 %v747_v0 }
 0x18f   :  { %646 = vmatpush3.msra.mxu1 %v349_v5 }
 0x190   :  { %647 = vmatprep.subr.mxu1 %v747_v0 }
 0x191   :  { %648 = vmatpush3.msra.mxu1 %v348_v6 }
 0x192   :  { %649 = vmatprep.subr.mxu1 %v747_v0 }
 0x193   :  { %650 = vmatpush3.msra.mxu1 %v347_v7 }
 0x194   :  { %651 = vmatprep.subr.mxu1 %v747_v0 }
 0x195   :  { %652 = vmatpush3.msra.mxu1 %v346_v8 }
 0x196   :  { %653 = vmatprep.subr.mxu1 %v747_v0 }
 0x197   :  { %654 = vmatpush3.msra.mxu1 %v345_v9 }
 0x198   :  { %655 = vmatprep.subr.mxu1 %v747_v0 }
 0x199   :  { %656 = vmatpush3.msra.mxu1 %v344_v10 }
 0x19a   :  { %657 = vmatprep.subr.mxu1 %v747_v0 }
 0x19b   :  { %658 = vmatpush3.msra.mxu1 %v343_v17 }
 0x19c   :  { %659 = vmatprep.subr.mxu1 %v747_v0 }
 0x19d   :  { %660 = vmatpush3.msra.mxu1 %v342_v18 }
 0x19e   :  { %661 = vmatprep.subr.mxu1 %v747_v0 }
 0x19f   :  { %662 = vmatpush3.msra.mxu1 %v341_v19 }
 0x1a0   :  { %663 = vmatprep.subr.mxu1 %v747_v0 }
 0x1a1   :  { %664 = vmatpush3.msra.mxu1 %v340_v20 }
 0x242   :  { %v236_v12 = vpop.f32.mrf.mxu1 }
 0x243   :  { %v237_v13 = vadd.f32 %v455_v11, %v236_v12 }
 0x244   :  { %v597_v14 = vpop.f32.mrf.mxu1 }
 0x245   :  { %v240_v15 = vmul.f32 0.2, %v237_v13 }
 0x247   :  { %v241_v16 = vmax.f32 %v237_v13, %v240_v15 }
 0x249   :  { %631 = vmatmul.mubr.f32.vlgmr.msra.gmra.mxu0 %v241_v16 }
 0x309   :  { %v333_v22 = vpop.f32.mrf.mxu0 }
 0x30a   :  { %v334_v23 = vadd.f32 %v457_v21, %v333_v22 }
 0x30b   :  { %v632_v24 = vpop.f32.mrf.mxu0 }
 0x30c   :  { %v337_v25 = vmul.f32 0.2, %v334_v23 }
 0x30e   :  { %v338_v26 = vmax.f32 %v334_v23, %v337_v25 }
 0x310   :  { %666 = vmatmul.mubr.f32.vlgmr.msra.gmra.mxu1 %v338_v26 }
 0x3d0   :  { %v430_v28 = vpop.f32.mrf.mxu1 }
 0x3d1   :  { %v431_v29 = vadd.f32 %v459_v27, %v430_v28 }
 0x3d2   :  { %v667_v30 = vpop.f32.mrf.mxu1 }
 0x3d3   :  { %v434_v0 = vmul.f32 0.2, %v431_v29 }
 0x3d5   :  { %v435_v31 = vmax.f32 %v431_v29, %v434_v0 }
 0x3d7   :  { %436 = vst [vmem:[#allocation7] sm:$0xff] %v435_v31 }
 0x3d8   :  { %728 = shalt.err (!%p725_p0)
}
 0x3d9   :  { %446 = dma.vmem_to_hbm [thread:$0]  %s444_s4, 128, %s871_s3, [#allocation4]  }
 0x3da   :  { %741 = dma.done.wait [#allocation4], 128  }
 0x3db   :  { %742 = vsyncadd [#allocation4], 4294967168 }
 0x3dc   :  { %450 = vsyncpa [#allocation3], 1 }
 0x3dd   :  { %451 = vsyncpa [#allocation6], 1 }
 0x3de   :  { %452 = vsyncpa [#allocation4], 1 }

</bundles_post_ra>
